<compile_context>
chip_gen: v6e
topology: v6e:2x2x1
jax: 0.10.0
libtpu: 0.0.40
codegen_flags: <defaults>
</compile_context>

<pallas_src>
import math
import functools

import jax
import jax.numpy as jnp
from jax.experimental import pallas as pl
from jax.experimental.pallas import tpu as pltpu

_NEG_INF = -1e10  # same masking constant as the PyTorch module


def elem_kernel(x_ref, w_qkv_ref, b_qkv_ref, w_aproj_ref,
                w_fc_ref, b_fc_ref, w_mproj_ref, lnb_ref,
                o_ref, *, n_head, eps, scale, compute_dtype):
    f32 = jnp.float32
    x3 = x_ref[...]                                   # (Bt, S, E) f32
    Bt, S, E = x3.shape
    hd = E // n_head
    M = Bt * S

    # Collapse (batch, seq) into a single M dimension.  Layout-free: the minor dim E
    # is untouched and S is the full second-minor dim (multiple of the sublane tile).
    x = x3.reshape(M, E)

    # ---- packed small params: rows = [ln1_g, ln1_b, ln2_g, ln2_b, b_aproj, b_mproj]
    lnb = lnb_ref[...]                                # (6, E) f32
    ln1_g, ln1_b = lnb[0:1], lnb[1:2]
    ln2_g, ln2_b = lnb[2:3], lnb[3:4]
    b_aproj, b_mproj = lnb[4:5], lnb[5:6]

    def layer_norm(v, g, b):
        u = jnp.mean(v, axis=-1, keepdims=True)
        var = jnp.mean(jnp.square(v - u), axis=-1, keepdims=True)
        return (v - u) * jax.lax.rsqrt(var + eps) * g + b

    # ---------------- ln_1 + fused QKV projection ----------------
    # One lane-dense 2-D matmul: (M, E) @ (E, 3E), f32 accumulation on the MXU.
    h1 = layer_norm(x, ln1_g, ln1_b)                  # (M, E) f32
    qkv = jnp.dot(h1.astype(compute_dtype), w_qkv_ref[...],
                  preferred_element_type=f32) + b_qkv_ref[...]          # (M, 3E) f32
    qkv = qkv.reshape(Bt, S, 3 * E)                   # leading-dim split only

    # ---------------- causal self-attention ----------------
    # TODO(synk): KV-tile this section (flash / online-softmax over a KV grid axis)
    # for non-toy sequence lengths; the full (Bt, S, S) scores only fit VMEM here.
    row = jax.lax.broadcasted_iota(jnp.int32, (S, S), 0)
    col = jax.lax.broadcasted_iota(jnp.int32, (S, S), 1)
    causal = (col <= row)[None, :, :]                 # (1, S, S) bool

    inv_sqrt_hd = 1.0 / math.sqrt(hd)
    att_heads = []
    for h in range(n_head):
        # Static lane slices of the fused QKV result (heads stay lane-concatenated;
        # only the score/att matmuls -- whose contraction is hd by definition -- are
        # per head).
        qh = qkv[:, :, h * hd:(h + 1) * hd].astype(compute_dtype)            # (Bt,S,hd)
        kh = qkv[:, :, E + h * hd:E + (h + 1) * hd].astype(compute_dtype)    # (Bt,S,hd)
        vh = qkv[:, :, 2 * E + h * hd:2 * E + (h + 1) * hd].astype(compute_dtype)

        s = jax.lax.dot_general(qh, kh, (((2,), (2,)), ((0,), (0,))),
                                preferred_element_type=f32)                  # (Bt,S,S)
        if scale:
            s = s * inv_sqrt_hd
        s = jnp.where(causal, s, _NEG_INF)            # select == w*b - 1e10*(1-b)
        s = s - jnp.max(s, axis=-1, keepdims=True)
        p = jnp.exp(s)
        p = p * pl.reciprocal(jnp.sum(p, axis=-1, keepdims=True), approx=True)

        ah = jax.lax.dot_general(p.astype(compute_dtype), vh,
                                 (((2,), (1,)), ((0,), (0,))),
                                 preferred_element_type=f32)                 # (Bt,S,hd)
        att_heads.append(ah)

    # merge_heads == lane concatenation of per-head outputs -> (Bt, S, E) -> (M, E)
    att = jnp.concatenate(att_heads, axis=-1).reshape(M, E)

    # Attention output projection: one lane-dense 2-D matmul with K = E.
    a = jnp.dot(att.astype(compute_dtype), w_aproj_ref[...],
                preferred_element_type=f32) + b_aproj                        # (M, E)
    x1 = x + a

    # ---------------- ln_2 + MLP (two lane-dense 2-D matmuls) ----------------
    h2 = layer_norm(x1, ln2_g, ln2_b)
    f = jnp.dot(h2.astype(compute_dtype), w_fc_ref[...],
                preferred_element_type=f32) + b_fc_ref[...]                  # (M, 4E)
    g = 0.5 * f * (1.0 + jnp.tanh(math.sqrt(2.0 / math.pi)
                                  * (f + 0.044715 * f * f * f)))
    m = jnp.dot(g.astype(compute_dtype), w_mproj_ref[...],
                preferred_element_type=f32) + b_mproj                        # (M, E)

    o_ref[...] = (x1 + m).reshape(Bt, S, E)


def elem_forward(x, params, *, n_head, eps, scale=False, batch_block=None,
                 compute_dtype=jnp.bfloat16, vmem_limit_bytes=None):
    B, S, E = x.shape
    assert E % n_head == 0

    if batch_block is None:
        # Keep the (parallel) grid length >= 2 so both v7x TensorCores get work.
        batch_block = B // 2 if (B >= 2 and B % 2 == 0) else B
    Bt = batch_block
    assert B % Bt == 0, "batch_block must divide batch"

    # Per-generation VMEM budget: ~3/4 of physical VMEM, capped at 100 MiB.
    #   v7x (64 MiB physical)  -> ~48 MiB ;  v5e / v6e (128 MiB) -> ~96 MiB.
    if vmem_limit_bytes is None:
        try:
            cap = pltpu.get_tpu_info().vmem_capacity_bytes
            vmem_limit_bytes = max(32 * 1024 * 1024,
                                   min(cap * 3 // 4, 100 * 1024 * 1024))
        except Exception:  # conservative fallback, safe on every generation
            vmem_limit_bytes = 48 * 1024 * 1024

    # ---- one-time parameter cast / repack (plain JAX, outside the kernel) ----
    w_qkv = params["w_attn"].astype(compute_dtype)     # (E, 3E)
    b_qkv = params["b_attn"].astype(jnp.float32)       # (1, 3E)
    w_aproj = params["w_aproj"].astype(compute_dtype)  # (E, E)
    w_fc = params["w_fc"].astype(compute_dtype)        # (E, 4E)
    b_fc = params["b_fc"].astype(jnp.float32)          # (1, 4E)
    w_mproj = params["w_mproj"].astype(compute_dtype)  # (4E, E)
    # pack all (1, E) vectors into one (6, E) array: fewer tiny DMA streams.
    lnb = jnp.concatenate([params["ln1_g"], params["ln1_b"],
                           params["ln2_g"], params["ln2_b"],
                           params["b_aproj"], params["b_mproj"]],
                          axis=0).astype(jnp.float32)

    param_arrays = [w_qkv, b_qkv, w_aproj, w_fc, b_fc, w_mproj, lnb]

    def full_spec(arr):
        nd = arr.ndim
        return pl.BlockSpec(arr.shape, lambda i, _nd=nd: (0,) * _nd)

    in_specs = ([pl.BlockSpec((Bt, S, E), lambda i: (i, 0, 0))]
                + [full_spec(p) for p in param_arrays])
    out_specs = pl.BlockSpec((Bt, S, E), lambda i: (i, 0, 0))

    kernel = functools.partial(elem_kernel, n_head=n_head, eps=eps, scale=scale,
                               compute_dtype=compute_dtype)

    return pl.pallas_call(
        kernel,
        out_shape=jax.ShapeDtypeStruct((B, S, E), jnp.float32),
        grid=(B // Bt,),
        in_specs=in_specs,
        out_specs=out_specs,
        compiler_params=pltpu.CompilerParams(
            dimension_semantics=("parallel",),
            vmem_limit_bytes=int(vmem_limit_bytes),
        ),
    )(x.astype(jnp.float32), *param_arrays)


# ---------------- pure-JAX reference (mirrors the PyTorch forward, f32) ----------------
def elem_reference(x, p, *, n_head, eps, scale=False):
    def ln(x, g, b):
        u = x.mean(-1, keepdims=True)
        s = ((x - u) ** 2).mean(-1, keepdims=True)
        return g * ((x - u) / jnp.sqrt(s + eps)) + b

    B, S, E = x.shape
    hd = E // n_head
    h = ln(x, p["ln1_g"], p["ln1_b"])
    qkv = h @ p["w_attn"] + p["b_attn"]
    q, k, v = jnp.split(qkv, 3, axis=-1)
    q = q.reshape(B, S, n_head, hd).transpose(0, 2, 1, 3)
    k = k.reshape(B, S, n_head, hd).transpose(0, 2, 1, 3)
    v = v.reshape(B, S, n_head, hd).transpose(0, 2, 1, 3)
    w = jnp.einsum("bhqd,bhkd->bhqk", q, k)
    if scale:
        w = w / math.sqrt(hd)
    bmask = jnp.tril(jnp.ones((S, S), jnp.float32))
    w = w * bmask - 1e10 * (1.0 - bmask)
    w = jax.nn.softmax(w, axis=-1)
    a = jnp.einsum("bhqk,bhkd->bhqd", w, v)
    a = a.transpose(0, 2, 1, 3).reshape(B, S, E)
    a = a @ p["w_aproj"] + p["b_aproj"]
    x1 = x + a
    h2 = ln(x1, p["ln2_g"], p["ln2_b"])
    f = h2 @ p["w_fc"] + p["b_fc"]
    f = 0.5 * f * (1.0 + jnp.tanh(math.sqrt(2.0 / math.pi) * (f + 0.044715 * f ** 3)))
    m = f @ p["w_mproj"] + p["b_mproj"]
    return x1 + m


if __name__ == "__main__":
    # small config consistent with the module: n_embd=32, n_head=4, n_ctx=seq=8, batch=2
    B, S, E = 2, 8, 32
    n_head = 4
    eps = 1e-12
    scale = False  # Elem default

    key = jax.random.PRNGKey(0)
    keys = jax.random.split(key, 12)

    x = jax.random.normal(keys[0], (B, S, E), dtype=jnp.float32)

    params = {
        "ln1_g": 1.0 + 0.1 * jax.random.normal(keys[1], (1, E), jnp.float32),
        "ln1_b": 0.1 * jax.random.normal(keys[2], (1, E), jnp.float32),
        "w_attn": 0.02 * jax.random.normal(keys[3], (E, 3 * E), jnp.float32),
        "b_attn": 0.02 * jax.random.normal(keys[4], (1, 3 * E), jnp.float32),
        "w_aproj": 0.02 * jax.random.normal(keys[5], (E, E), jnp.float32),
        "b_aproj": 0.02 * jax.random.normal(keys[6], (1, E), jnp.float32),
        "ln2_g": 1.0 + 0.1 * jax.random.normal(keys[7], (1, E), jnp.float32),
        "ln2_b": 0.1 * jax.random.normal(keys[8], (1, E), jnp.float32),
        "w_fc": 0.02 * jax.random.normal(keys[9], (E, 4 * E), jnp.float32),
        "b_fc": 0.02 * jax.random.normal(keys[10], (1, 4 * E), jnp.float32),
        "w_mproj": 0.02 * jax.random.normal(keys[11], (4 * E, E), jnp.float32),
        "b_mproj": jnp.zeros((1, E), jnp.float32),
    }

    out = elem_forward(x, params, n_head=n_head, eps=eps, scale=scale)
    out = jax.block_until_ready(out)

    ref = elem_reference(x, params, n_head=n_head, eps=eps, scale=scale)
    assert out.shape == (B, S, E)
    # bf16 matmul operands + approx softmax reciprocal -> slightly looser tolerance
    assert jnp.allclose(out, ref, atol=5e-3, rtol=5e-3), "mismatch vs reference"

    print("KERNEL_OK")
</pallas_src>

<mosaic_0001>
module attributes {stable_mosaic.version = 11 : i64} {
  func.func @elem_kernel(%arg0: i32, %arg1: memref<1x8x32xf32, #tpu.memory_space<vmem>>, %arg2: memref<32x96xbf16, #tpu.memory_space<vmem>>, %arg3: memref<1x96xf32, #tpu.memory_space<vmem>>, %arg4: memref<32x32xbf16, #tpu.memory_space<vmem>>, %arg5: memref<32x128xbf16, #tpu.memory_space<vmem>>, %arg6: memref<1x128xf32, #tpu.memory_space<vmem>>, %arg7: memref<128x32xbf16, #tpu.memory_space<vmem>>, %arg8: memref<6x32xf32, #tpu.memory_space<vmem>>, %arg9: memref<1x8x32xf32, #tpu.memory_space<vmem>>) attributes {dimension_semantics = [#tpu.dimension_semantics<parallel>], iteration_bounds = array<i64: 2>, scalar_prefetch = 0 : i64, scratch_operands = 0 : i64, tpu.core_type = #tpu.core_type<tc>, window_params = [{transform_indices = @transform_0, window_bounds = array<i64: 1, 8, 32>}, {pipeline_mode = #tpu.pipeline_mode<synchronous>, transform_indices = @transform_1, window_bounds = array<i64: 32, 96>}, {pipeline_mode = #tpu.pipeline_mode<synchronous>, transform_indices = @transform_2, window_bounds = array<i64: 1, 96>}, {pipeline_mode = #tpu.pipeline_mode<synchronous>, transform_indices = @transform_3, window_bounds = array<i64: 32, 32>}, {pipeline_mode = #tpu.pipeline_mode<synchronous>, transform_indices = @transform_4, window_bounds = array<i64: 32, 128>}, {pipeline_mode = #tpu.pipeline_mode<synchronous>, transform_indices = @transform_5, window_bounds = array<i64: 1, 128>}, {pipeline_mode = #tpu.pipeline_mode<synchronous>, transform_indices = @transform_6, window_bounds = array<i64: 128, 32>}, {pipeline_mode = #tpu.pipeline_mode<synchronous>, transform_indices = @transform_7, window_bounds = array<i64: 6, 32>}, {transform_indices = @transform_8, window_bounds = array<i64: 1, 8, 32>}]} {
    %c0 = arith.constant 0 : index
    %c0_0 = arith.constant 0 : index
    %c0_1 = arith.constant 0 : index
    %0 = vector.load %arg1[%c0, %c0_0, %c0_1] : memref<1x8x32xf32, #tpu.memory_space<vmem>>, vector<1x8x32xf32>
    %1 = vector.shape_cast %0 : vector<1x8x32xf32> to vector<8x32xf32>
    %c0_2 = arith.constant 0 : index
    %c0_3 = arith.constant 0 : index
    %2 = vector.load %arg8[%c0_2, %c0_3] : memref<6x32xf32, #tpu.memory_space<vmem>>, vector<6x32xf32>
    %3 = vector.extract_strided_slice %2 {offsets = [0, 0], sizes = [1, 32], strides = [1, 1]} : vector<6x32xf32> to vector<1x32xf32>
    %4 = vector.extract_strided_slice %2 {offsets = [1, 0], sizes = [1, 32], strides = [1, 1]} : vector<6x32xf32> to vector<1x32xf32>
    %5 = vector.extract_strided_slice %2 {offsets = [2, 0], sizes = [1, 32], strides = [1, 1]} : vector<6x32xf32> to vector<1x32xf32>
    %6 = vector.extract_strided_slice %2 {offsets = [3, 0], sizes = [1, 32], strides = [1, 1]} : vector<6x32xf32> to vector<1x32xf32>
    %7 = vector.extract_strided_slice %2 {offsets = [4, 0], sizes = [1, 32], strides = [1, 1]} : vector<6x32xf32> to vector<1x32xf32>
    %8 = vector.extract_strided_slice %2 {offsets = [5, 0], sizes = [1, 32], strides = [1, 1]} : vector<6x32xf32> to vector<1x32xf32>
    %cst = arith.constant dense<0.000000e+00> : vector<8xf32>
    %9 = vector.multi_reduction <add>, %1, %cst [1] : vector<8x32xf32> to vector<8xf32>
    %10 = vector.shape_cast %9 : vector<8xf32> to vector<8x1xf32>
    %cst_4 = arith.constant 3.200000e+01 : f32
    %11 = vector.broadcast %cst_4 : f32 to vector<8x1xf32>
    %12 = arith.divf %10, %11 : vector<8x1xf32>
    %13 = vector.broadcast %12 : vector<8x1xf32> to vector<8x32xf32>
    %14 = arith.subf %1, %13 : vector<8x32xf32>
    %15 = arith.mulf %14, %14 : vector<8x32xf32>
    %cst_5 = arith.constant dense<0.000000e+00> : vector<8xf32>
    %16 = vector.multi_reduction <add>, %15, %cst_5 [1] : vector<8x32xf32> to vector<8xf32>
    %17 = vector.shape_cast %16 : vector<8xf32> to vector<8x1xf32>
    %cst_6 = arith.constant 3.200000e+01 : f32
    %18 = vector.broadcast %cst_6 : f32 to vector<8x1xf32>
    %19 = arith.divf %17, %18 : vector<8x1xf32>
    %20 = vector.broadcast %12 : vector<8x1xf32> to vector<8x32xf32>
    %21 = arith.subf %1, %20 : vector<8x32xf32>
    %cst_7 = arith.constant 9.99999996E-13 : f32
    %22 = vector.broadcast %cst_7 : f32 to vector<8x1xf32>
    %23 = arith.addf %19, %22 : vector<8x1xf32>
    %24 = math.rsqrt %23 : vector<8x1xf32>
    %25 = vector.broadcast %24 : vector<8x1xf32> to vector<8x32xf32>
    %26 = arith.mulf %21, %25 : vector<8x32xf32>
    %27 = vector.broadcast %3 : vector<1x32xf32> to vector<8x32xf32>
    %28 = arith.mulf %26, %27 : vector<8x32xf32>
    %29 = vector.broadcast %4 : vector<1x32xf32> to vector<8x32xf32>
    %30 = arith.addf %28, %29 : vector<8x32xf32>
    %31 = arith.truncf %30 : vector<8x32xf32> to vector<8x32xbf16>
    %c0_8 = arith.constant 0 : index
    %c0_9 = arith.constant 0 : index
    %32 = vector.load %arg2[%c0_8, %c0_9] : memref<32x96xbf16, #tpu.memory_space<vmem>>, vector<32x96xbf16>
    %cst_10 = arith.constant dense<0.000000e+00> : vector<8x96xf32>
    %33 = tpu.matmul %31, %32, %cst_10 {dimension_numbers = #tpu.dot_dimension_numbers<[1], [0], [0], [1], [0, 0, 1, 1], [], []>} : vector<8x32xbf16>, vector<32x96xbf16>, vector<8x96xf32> -> vector<8x96xf32>
    %c0_11 = arith.constant 0 : index
    %c0_12 = arith.constant 0 : index
    %34 = vector.load %arg3[%c0_11, %c0_12] : memref<1x96xf32, #tpu.memory_space<vmem>>, vector<1x96xf32>
    %35 = vector.broadcast %34 : vector<1x96xf32> to vector<8x96xf32>
    %36 = arith.addf %33, %35 : vector<8x96xf32>
    %37 = vector.shape_cast %36 : vector<8x96xf32> to vector<1x8x96xf32>
    %38 = tpu.iota {dimensions = array<i32: 0>} : vector<8x8xi32>
    %39 = tpu.iota {dimensions = array<i32: 1>} : vector<8x8xi32>
    %40 = arith.cmpi sle, %39, %38 : vector<8x8xi32>
    %41 = vector.shape_cast %40 : vector<8x8xi1> to vector<1x8x8xi1>
    %42 = vector.extract_strided_slice %37 {offsets = [0, 0, 0], sizes = [1, 8, 8], strides = [1, 1, 1]} : vector<1x8x96xf32> to vector<1x8x8xf32>
    %43 = arith.truncf %42 : vector<1x8x8xf32> to vector<1x8x8xbf16>
    %44 = vector.extract_strided_slice %37 {offsets = [0, 0, 32], sizes = [1, 8, 8], strides = [1, 1, 1]} : vector<1x8x96xf32> to vector<1x8x8xf32>
    %45 = arith.truncf %44 : vector<1x8x8xf32> to vector<1x8x8xbf16>
    %46 = vector.extract_strided_slice %37 {offsets = [0, 0, 64], sizes = [1, 8, 8], strides = [1, 1, 1]} : vector<1x8x96xf32> to vector<1x8x8xf32>
    %47 = arith.truncf %46 : vector<1x8x8xf32> to vector<1x8x8xbf16>
    %cst_13 = arith.constant dense<0.000000e+00> : vector<1x8x8xf32>
    %48 = tpu.matmul %43, %45, %cst_13 {dimension_numbers = #tpu.dot_dimension_numbers<[2], [2], [1], [1], [0, 0, 0, 1, 1, 1], [0], [0]>} : vector<1x8x8xbf16>, vector<1x8x8xbf16>, vector<1x8x8xf32> -> vector<1x8x8xf32>
    %cst_14 = arith.constant -1.000000e+10 : f32
    %49 = vector.broadcast %cst_14 : f32 to vector<1x8x8xf32>
    %50 = arith.select %41, %48, %49 : vector<1x8x8xi1>, vector<1x8x8xf32>
    %cst_15 = arith.constant dense<0xFF800000> : vector<1x8xf32>
    %51 = vector.multi_reduction <maximumf>, %50, %cst_15 [2] : vector<1x8x8xf32> to vector<1x8xf32>
    %52 = vector.shape_cast %51 : vector<1x8xf32> to vector<1x8x1xf32>
    %53 = vector.broadcast %52 : vector<1x8x1xf32> to vector<1x8x8xf32>
    %54 = arith.subf %50, %53 : vector<1x8x8xf32>
    %55 = math.exp %54 : vector<1x8x8xf32>
    %cst_16 = arith.constant dense<0.000000e+00> : vector<1x8xf32>
    %56 = vector.multi_reduction <add>, %55, %cst_16 [2] : vector<1x8x8xf32> to vector<1x8xf32>
    %57 = vector.shape_cast %56 : vector<1x8xf32> to vector<1x8x1xf32>
    %58 = tpu.reciprocal %57 {approx = true} : vector<1x8x1xf32> -> vector<1x8x1xf32>
    %59 = vector.broadcast %58 : vector<1x8x1xf32> to vector<1x8x8xf32>
    %60 = arith.mulf %55, %59 : vector<1x8x8xf32>
    %61 = arith.truncf %60 : vector<1x8x8xf32> to vector<1x8x8xbf16>
    %cst_17 = arith.constant dense<0.000000e+00> : vector<1x8x8xf32>
    %62 = tpu.matmul %61, %47, %cst_17 {dimension_numbers = #tpu.dot_dimension_numbers<[2], [1], [1], [2], [0, 0, 0, 1, 1, 2], [0], [0]>} : vector<1x8x8xbf16>, vector<1x8x8xbf16>, vector<1x8x8xf32> -> vector<1x8x8xf32>
    %63 = vector.extract_strided_slice %37 {offsets = [0, 0, 8], sizes = [1, 8, 8], strides = [1, 1, 1]} : vector<1x8x96xf32> to vector<1x8x8xf32>
    %64 = arith.truncf %63 : vector<1x8x8xf32> to vector<1x8x8xbf16>
    %65 = vector.extract_strided_slice %37 {offsets = [0, 0, 40], sizes = [1, 8, 8], strides = [1, 1, 1]} : vector<1x8x96xf32> to vector<1x8x8xf32>
    %66 = arith.truncf %65 : vector<1x8x8xf32> to vector<1x8x8xbf16>
    %67 = vector.extract_strided_slice %37 {offsets = [0, 0, 72], sizes = [1, 8, 8], strides = [1, 1, 1]} : vector<1x8x96xf32> to vector<1x8x8xf32>
    %68 = arith.truncf %67 : vector<1x8x8xf32> to vector<1x8x8xbf16>
    %cst_18 = arith.constant dense<0.000000e+00> : vector<1x8x8xf32>
    %69 = tpu.matmul %64, %66, %cst_18 {dimension_numbers = #tpu.dot_dimension_numbers<[2], [2], [1], [1], [0, 0, 0, 1, 1, 1], [0], [0]>} : vector<1x8x8xbf16>, vector<1x8x8xbf16>, vector<1x8x8xf32> -> vector<1x8x8xf32>
    %cst_19 = arith.constant -1.000000e+10 : f32
    %70 = vector.broadcast %cst_19 : f32 to vector<1x8x8xf32>
    %71 = arith.select %41, %69, %70 : vector<1x8x8xi1>, vector<1x8x8xf32>
    %cst_20 = arith.constant dense<0xFF800000> : vector<1x8xf32>
    %72 = vector.multi_reduction <maximumf>, %71, %cst_20 [2] : vector<1x8x8xf32> to vector<1x8xf32>
    %73 = vector.shape_cast %72 : vector<1x8xf32> to vector<1x8x1xf32>
    %74 = vector.broadcast %73 : vector<1x8x1xf32> to vector<1x8x8xf32>
    %75 = arith.subf %71, %74 : vector<1x8x8xf32>
    %76 = math.exp %75 : vector<1x8x8xf32>
    %cst_21 = arith.constant dense<0.000000e+00> : vector<1x8xf32>
    %77 = vector.multi_reduction <add>, %76, %cst_21 [2] : vector<1x8x8xf32> to vector<1x8xf32>
    %78 = vector.shape_cast %77 : vector<1x8xf32> to vector<1x8x1xf32>
    %79 = tpu.reciprocal %78 {approx = true} : vector<1x8x1xf32> -> vector<1x8x1xf32>
    %80 = vector.broadcast %79 : vector<1x8x1xf32> to vector<1x8x8xf32>
    %81 = arith.mulf %76, %80 : vector<1x8x8xf32>
    %82 = arith.truncf %81 : vector<1x8x8xf32> to vector<1x8x8xbf16>
    %cst_22 = arith.constant dense<0.000000e+00> : vector<1x8x8xf32>
    %83 = tpu.matmul %82, %68, %cst_22 {dimension_numbers = #tpu.dot_dimension_numbers<[2], [1], [1], [2], [0, 0, 0, 1, 1, 2], [0], [0]>} : vector<1x8x8xbf16>, vector<1x8x8xbf16>, vector<1x8x8xf32> -> vector<1x8x8xf32>
    %84 = vector.extract_strided_slice %37 {offsets = [0, 0, 16], sizes = [1, 8, 8], strides = [1, 1, 1]} : vector<1x8x96xf32> to vector<1x8x8xf32>
    %85 = arith.truncf %84 : vector<1x8x8xf32> to vector<1x8x8xbf16>
    %86 = vector.extract_strided_slice %37 {offsets = [0, 0, 48], sizes = [1, 8, 8], strides = [1, 1, 1]} : vector<1x8x96xf32> to vector<1x8x8xf32>
    %87 = arith.truncf %86 : vector<1x8x8xf32> to vector<1x8x8xbf16>
    %88 = vector.extract_strided_slice %37 {offsets = [0, 0, 80], sizes = [1, 8, 8], strides = [1, 1, 1]} : vector<1x8x96xf32> to vector<1x8x8xf32>
    %89 = arith.truncf %88 : vector<1x8x8xf32> to vector<1x8x8xbf16>
    %cst_23 = arith.constant dense<0.000000e+00> : vector<1x8x8xf32>
    %90 = tpu.matmul %85, %87, %cst_23 {dimension_numbers = #tpu.dot_dimension_numbers<[2], [2], [1], [1], [0, 0, 0, 1, 1, 1], [0], [0]>} : vector<1x8x8xbf16>, vector<1x8x8xbf16>, vector<1x8x8xf32> -> vector<1x8x8xf32>
    %cst_24 = arith.constant -1.000000e+10 : f32
    %91 = vector.broadcast %cst_24 : f32 to vector<1x8x8xf32>
    %92 = arith.select %41, %90, %91 : vector<1x8x8xi1>, vector<1x8x8xf32>
    %cst_25 = arith.constant dense<0xFF800000> : vector<1x8xf32>
    %93 = vector.multi_reduction <maximumf>, %92, %cst_25 [2] : vector<1x8x8xf32> to vector<1x8xf32>
    %94 = vector.shape_cast %93 : vector<1x8xf32> to vector<1x8x1xf32>
    %95 = vector.broadcast %94 : vector<1x8x1xf32> to vector<1x8x8xf32>
    %96 = arith.subf %92, %95 : vector<1x8x8xf32>
    %97 = math.exp %96 : vector<1x8x8xf32>
    %cst_26 = arith.constant dense<0.000000e+00> : vector<1x8xf32>
    %98 = vector.multi_reduction <add>, %97, %cst_26 [2] : vector<1x8x8xf32> to vector<1x8xf32>
    %99 = vector.shape_cast %98 : vector<1x8xf32> to vector<1x8x1xf32>
    %100 = tpu.reciprocal %99 {approx = true} : vector<1x8x1xf32> -> vector<1x8x1xf32>
    %101 = vector.broadcast %100 : vector<1x8x1xf32> to vector<1x8x8xf32>
    %102 = arith.mulf %97, %101 : vector<1x8x8xf32>
    %103 = arith.truncf %102 : vector<1x8x8xf32> to vector<1x8x8xbf16>
    %cst_27 = arith.constant dense<0.000000e+00> : vector<1x8x8xf32>
    %104 = tpu.matmul %103, %89, %cst_27 {dimension_numbers = #tpu.dot_dimension_numbers<[2], [1], [1], [2], [0, 0, 0, 1, 1, 2], [0], [0]>} : vector<1x8x8xbf16>, vector<1x8x8xbf16>, vector<1x8x8xf32> -> vector<1x8x8xf32>
    %105 = vector.extract_strided_slice %37 {offsets = [0, 0, 24], sizes = [1, 8, 8], strides = [1, 1, 1]} : vector<1x8x96xf32> to vector<1x8x8xf32>
    %106 = arith.truncf %105 : vector<1x8x8xf32> to vector<1x8x8xbf16>
    %107 = vector.extract_strided_slice %37 {offsets = [0, 0, 56], sizes = [1, 8, 8], strides = [1, 1, 1]} : vector<1x8x96xf32> to vector<1x8x8xf32>
    %108 = arith.truncf %107 : vector<1x8x8xf32> to vector<1x8x8xbf16>
    %109 = vector.extract_strided_slice %37 {offsets = [0, 0, 88], sizes = [1, 8, 8], strides = [1, 1, 1]} : vector<1x8x96xf32> to vector<1x8x8xf32>
    %110 = arith.truncf %109 : vector<1x8x8xf32> to vector<1x8x8xbf16>
    %cst_28 = arith.constant dense<0.000000e+00> : vector<1x8x8xf32>
    %111 = tpu.matmul %106, %108, %cst_28 {dimension_numbers = #tpu.dot_dimension_numbers<[2], [2], [1], [1], [0, 0, 0, 1, 1, 1], [0], [0]>} : vector<1x8x8xbf16>, vector<1x8x8xbf16>, vector<1x8x8xf32> -> vector<1x8x8xf32>
    %cst_29 = arith.constant -1.000000e+10 : f32
    %112 = vector.broadcast %cst_29 : f32 to vector<1x8x8xf32>
    %113 = arith.select %41, %111, %112 : vector<1x8x8xi1>, vector<1x8x8xf32>
    %cst_30 = arith.constant dense<0xFF800000> : vector<1x8xf32>
    %114 = vector.multi_reduction <maximumf>, %113, %cst_30 [2] : vector<1x8x8xf32> to vector<1x8xf32>
    %115 = vector.shape_cast %114 : vector<1x8xf32> to vector<1x8x1xf32>
    %116 = vector.broadcast %115 : vector<1x8x1xf32> to vector<1x8x8xf32>
    %117 = arith.subf %113, %116 : vector<1x8x8xf32>
    %118 = math.exp %117 : vector<1x8x8xf32>
    %cst_31 = arith.constant dense<0.000000e+00> : vector<1x8xf32>
    %119 = vector.multi_reduction <add>, %118, %cst_31 [2] : vector<1x8x8xf32> to vector<1x8xf32>
    %120 = vector.shape_cast %119 : vector<1x8xf32> to vector<1x8x1xf32>
    %121 = tpu.reciprocal %120 {approx = true} : vector<1x8x1xf32> -> vector<1x8x1xf32>
    %122 = vector.broadcast %121 : vector<1x8x1xf32> to vector<1x8x8xf32>
    %123 = arith.mulf %118, %122 : vector<1x8x8xf32>
    %124 = arith.truncf %123 : vector<1x8x8xf32> to vector<1x8x8xbf16>
    %cst_32 = arith.constant dense<0.000000e+00> : vector<1x8x8xf32>
    %125 = tpu.matmul %124, %110, %cst_32 {dimension_numbers = #tpu.dot_dimension_numbers<[2], [1], [1], [2], [0, 0, 0, 1, 1, 2], [0], [0]>} : vector<1x8x8xbf16>, vector<1x8x8xbf16>, vector<1x8x8xf32> -> vector<1x8x8xf32>
    %126 = tpu.concatenate %62, %83, %104, %125 in 2 : vector<1x8x8xf32>, vector<1x8x8xf32>, vector<1x8x8xf32>, vector<1x8x8xf32> -> vector<1x8x32xf32>
    %127 = vector.shape_cast %126 : vector<1x8x32xf32> to vector<8x32xf32>
    %128 = arith.truncf %127 : vector<8x32xf32> to vector<8x32xbf16>
    %c0_33 = arith.constant 0 : index
    %c0_34 = arith.constant 0 : index
    %129 = vector.load %arg4[%c0_33, %c0_34] : memref<32x32xbf16, #tpu.memory_space<vmem>>, vector<32x32xbf16>
    %cst_35 = arith.constant dense<0.000000e+00> : vector<8x32xf32>
    %130 = tpu.matmul %128, %129, %cst_35 {dimension_numbers = #tpu.dot_dimension_numbers<[1], [0], [0], [1], [0, 0, 1, 1], [], []>} : vector<8x32xbf16>, vector<32x32xbf16>, vector<8x32xf32> -> vector<8x32xf32>
    %131 = vector.broadcast %7 : vector<1x32xf32> to vector<8x32xf32>
    %132 = arith.addf %130, %131 : vector<8x32xf32>
    %133 = arith.addf %1, %132 : vector<8x32xf32>
    %cst_36 = arith.constant dense<0.000000e+00> : vector<8xf32>
    %134 = vector.multi_reduction <add>, %133, %cst_36 [1] : vector<8x32xf32> to vector<8xf32>
    %135 = vector.shape_cast %134 : vector<8xf32> to vector<8x1xf32>
    %cst_37 = arith.constant 3.200000e+01 : f32
    %136 = vector.broadcast %cst_37 : f32 to vector<8x1xf32>
    %137 = arith.divf %135, %136 : vector<8x1xf32>
    %138 = vector.broadcast %137 : vector<8x1xf32> to vector<8x32xf32>
    %139 = arith.subf %133, %138 : vector<8x32xf32>
    %140 = arith.mulf %139, %139 : vector<8x32xf32>
    %cst_38 = arith.constant dense<0.000000e+00> : vector<8xf32>
    %141 = vector.multi_reduction <add>, %140, %cst_38 [1] : vector<8x32xf32> to vector<8xf32>
    %142 = vector.shape_cast %141 : vector<8xf32> to vector<8x1xf32>
    %cst_39 = arith.constant 3.200000e+01 : f32
    %143 = vector.broadcast %cst_39 : f32 to vector<8x1xf32>
    %144 = arith.divf %142, %143 : vector<8x1xf32>
    %145 = vector.broadcast %137 : vector<8x1xf32> to vector<8x32xf32>
    %146 = arith.subf %133, %145 : vector<8x32xf32>
    %cst_40 = arith.constant 9.99999996E-13 : f32
    %147 = vector.broadcast %cst_40 : f32 to vector<8x1xf32>
    %148 = arith.addf %144, %147 : vector<8x1xf32>
    %149 = math.rsqrt %148 : vector<8x1xf32>
    %150 = vector.broadcast %149 : vector<8x1xf32> to vector<8x32xf32>
    %151 = arith.mulf %146, %150 : vector<8x32xf32>
    %152 = vector.broadcast %5 : vector<1x32xf32> to vector<8x32xf32>
    %153 = arith.mulf %151, %152 : vector<8x32xf32>
    %154 = vector.broadcast %6 : vector<1x32xf32> to vector<8x32xf32>
    %155 = arith.addf %153, %154 : vector<8x32xf32>
    %156 = arith.truncf %155 : vector<8x32xf32> to vector<8x32xbf16>
    %c0_41 = arith.constant 0 : index
    %c0_42 = arith.constant 0 : index
    %157 = vector.load %arg5[%c0_41, %c0_42] : memref<32x128xbf16, #tpu.memory_space<vmem>>, vector<32x128xbf16>
    %cst_43 = arith.constant dense<0.000000e+00> : vector<8x128xf32>
    %158 = tpu.matmul %156, %157, %cst_43 {dimension_numbers = #tpu.dot_dimension_numbers<[1], [0], [0], [1], [0, 0, 1, 1], [], []>} : vector<8x32xbf16>, vector<32x128xbf16>, vector<8x128xf32> -> vector<8x128xf32>
    %c0_44 = arith.constant 0 : index
    %c0_45 = arith.constant 0 : index
    %159 = vector.load %arg6[%c0_44, %c0_45] : memref<1x128xf32, #tpu.memory_space<vmem>>, vector<1x128xf32>
    %160 = vector.broadcast %159 : vector<1x128xf32> to vector<8x128xf32>
    %161 = arith.addf %158, %160 : vector<8x128xf32>
    %cst_46 = arith.constant 5.000000e-01 : f32
    %162 = vector.broadcast %cst_46 : f32 to vector<8x128xf32>
    %163 = arith.mulf %162, %161 : vector<8x128xf32>
    %cst_47 = arith.constant 4.471500e-02 : f32
    %164 = vector.broadcast %cst_47 : f32 to vector<8x128xf32>
    %165 = arith.mulf %164, %161 : vector<8x128xf32>
    %166 = arith.mulf %165, %161 : vector<8x128xf32>
    %167 = arith.mulf %166, %161 : vector<8x128xf32>
    %168 = arith.addf %161, %167 : vector<8x128xf32>
    %cst_48 = arith.constant 0.797884583 : f32
    %169 = vector.broadcast %cst_48 : f32 to vector<8x128xf32>
    %170 = arith.mulf %169, %168 : vector<8x128xf32>
    %171 = math.tanh %170 : vector<8x128xf32>
    %cst_49 = arith.constant 1.000000e+00 : f32
    %172 = vector.broadcast %cst_49 : f32 to vector<8x128xf32>
    %173 = arith.addf %172, %171 : vector<8x128xf32>
    %174 = arith.mulf %163, %173 : vector<8x128xf32>
    %175 = arith.truncf %174 : vector<8x128xf32> to vector<8x128xbf16>
    %c0_50 = arith.constant 0 : index
    %c0_51 = arith.constant 0 : index
    %176 = vector.load %arg7[%c0_50, %c0_51] : memref<128x32xbf16, #tpu.memory_space<vmem>>, vector<128x32xbf16>
    %cst_52 = arith.constant dense<0.000000e+00> : vector<8x32xf32>
    %177 = tpu.matmul %175, %176, %cst_52 {dimension_numbers = #tpu.dot_dimension_numbers<[1], [0], [0], [1], [0, 0, 1, 1], [], []>} : vector<8x128xbf16>, vector<128x32xbf16>, vector<8x32xf32> -> vector<8x32xf32>
    %178 = vector.broadcast %8 : vector<1x32xf32> to vector<8x32xf32>
    %179 = arith.addf %177, %178 : vector<8x32xf32>
    %180 = arith.addf %133, %179 : vector<8x32xf32>
    %181 = vector.shape_cast %180 : vector<8x32xf32> to vector<1x8x32xf32>
    %c0_53 = arith.constant 0 : index
    %c0_54 = arith.constant 0 : index
    %c0_55 = arith.constant 0 : index
    %182 = vector.load %arg9[%c0_53, %c0_54, %c0_55] : memref<1x8x32xf32, #tpu.memory_space<vmem>>, vector<1x8x32xf32>
    tpu.vector_store %arg9[%c0_53, %c0_54, %c0_55], %181 {strides = array<i32>} : memref<1x8x32xf32, #tpu.memory_space<vmem>>, vector<1x8x32xf32>,
    return
  }
  func.func @transform_0(%arg0: i32) -> (i32, i32, i32) {
    %c0_i32 = arith.constant 0 : i32
    %c0_i32_0 = arith.constant 0 : i32
    %c0_i32_1 = arith.constant 0 : i32
    return %arg0, %c0_i32, %c0_i32_0 : i32, i32, i32
  }
  func.func @transform_1(%arg0: i32) -> (i32, i32) {
    %c0_i32 = arith.constant 0 : i32
    %c0_i32_0 = arith.constant 0 : i32
    %c0_i32_1 = arith.constant 0 : i32
    return %c0_i32, %c0_i32_0 : i32, i32
  }
  func.func @transform_2(%arg0: i32) -> (i32, i32) {
    %c0_i32 = arith.constant 0 : i32
    %c0_i32_0 = arith.constant 0 : i32
    %c0_i32_1 = arith.constant 0 : i32
    return %c0_i32, %c0_i32_0 : i32, i32
  }
  func.func @transform_3(%arg0: i32) -> (i32, i32) {
    %c0_i32 = arith.constant 0 : i32
    %c0_i32_0 = arith.constant 0 : i32
    %c0_i32_1 = arith.constant 0 : i32
    return %c0_i32, %c0_i32_0 : i32, i32
  }
  func.func @transform_4(%arg0: i32) -> (i32, i32) {
    %c0_i32 = arith.constant 0 : i32
    %c0_i32_0 = arith.constant 0 : i32
    %c0_i32_1 = arith.constant 0 : i32
    return %c0_i32, %c0_i32_0 : i32, i32
  }
  func.func @transform_5(%arg0: i32) -> (i32, i32) {
    %c0_i32 = arith.constant 0 : i32
    %c0_i32_0 = arith.constant 0 : i32
    %c0_i32_1 = arith.constant 0 : i32
    return %c0_i32, %c0_i32_0 : i32, i32
  }
  func.func @transform_6(%arg0: i32) -> (i32, i32) {
    %c0_i32 = arith.constant 0 : i32
    %c0_i32_0 = arith.constant 0 : i32
    %c0_i32_1 = arith.constant 0 : i32
    return %c0_i32, %c0_i32_0 : i32, i32
  }
  func.func @transform_7(%arg0: i32) -> (i32, i32) {
    %c0_i32 = arith.constant 0 : i32
    %c0_i32_0 = arith.constant 0 : i32
    %c0_i32_1 = arith.constant 0 : i32
    return %c0_i32, %c0_i32_0 : i32, i32
  }
  func.func @transform_8(%arg0: i32) -> (i32, i32, i32) {
    %c0_i32 = arith.constant 0 : i32
    %c0_i32_0 = arith.constant 0 : i32
    %c0_i32_1 = arith.constant 0 : i32
    return %arg0, %c0_i32, %c0_i32_0 : i32, i32, i32
  }
}

</mosaic_0001>

<bundles_post_ra>
// kernel: tpu_custom_call.1
= control target key start
LH: loop header
LB: loop body
LE: loop exit
PB: predicated region body
PF: predicated region fallthrough
CT: control target
= control target key end

     0   :  { %13 = vsyncpa [#allocation3], 0  ;;  %s1870_s0 = inlined_call_operand.vmem [shape: f32[2,8,32], index: 0, kind: input, shape index: {}]   ;;  %s1871_s1 = inlined_call_operand.vmem [shape: bf16[32,96], index: 1, kind: input, shape index: {}]   ;;  %s1872_s2 = inlined_call_operand.vmem [shape: f32[1,96], index: 2, kind: input, shape index: {}]   ;;  %s1873_s3 = inlined_call_operand.vmem [shape: bf16[32,32], index: 3, kind: input, shape index: {}]   ;;  %s1874_s4 = inlined_call_operand.vmem [shape: bf16[32,128], index: 4, kind: input, shape index: {}]   ;;  %s1875_s5 = inlined_call_operand.vmem [shape: f32[1,128], index: 5, kind: input, shape index: {}]   ;;  %s1876_s6 = inlined_call_operand.vmem [shape: bf16[128,32], index: 6, kind: input, shape index: {}]   ;;  %s1877_s7 = inlined_call_operand.vmem [shape: f32[6,32], index: 7, kind: input, shape index: {}]   ;;  %s1878_s8 = inlined_call_operand.hbm [shape: f32[2,8,32], index: 8, kind: output, shape index: {}]  }
   0x1   :  { %15 = vsyncpa [#allocation3 + $0x1], 0  ;;  %s1590_s27 = smov 0   ;;  %s1592_s28 = smov 0  }
   0x2   :  { %s1594_s29 = smov 0   ;;  %s1596_s30 = smov 0  }
   0x3 LB: > { %s1611_s9 = sadd.s32 4294967295, %s1526_s30   ;;  %s1212_s10 = sadd.s32 4294967294, %s1526_s30   ;;  %s1526_s30 = sphi %s1596_s30, %s1884_s30   ;;  %s1522_s29 = sphi %s1594_s29, %s1883_s29   ;;  %s1518_s28 = sphi %s1592_s28, %s1882_s28   ;;  %s1514_s27 = sphi %s1590_s27, %s1881_s27  }
   0x4   : > { %s1615_s11 = sadd.s32 1, %s1526_s30   ;;  %s201_s12 = sadd.s32 1, %s1522_s29 }
   0x5   : > { %s198_s13 = ssub.s32 %s1526_s30, %s1615_s11  ;;  %p211_p0 = scmp.ne.s32.totalorder %s1522_s29, %s1518_s28 }
   0x6   : > { %p199_p1 = scmp.eq.s32.totalorder %s198_s13, 0  ;;  %p212_p2 = scmp.eq.s32.totalorder %s1611_s9, 1 }
   0x7   : > { %p217_p3 = scmp.ne.s32.totalorder %s1518_s28, %s1514_s27  ;;  %p218_p4 = scmp.eq.s32.totalorder %s1212_s10, 1 }
   0x8   : > { %s1626_s14 = scalar_select %p199_p1, %s1522_s29, %s201_s12  }
   0x9   : > { %p1628_p5 = por %p212_p2, %p211_p0  ;;  %p1632_p6 = por %p218_p4, %p217_p3 }
   0xa   : > { %p1215_p7 = scmp.ge.s32.totalorder %s1526_s30, 1  ;;  %p264_p8 = scmp.lt.s32.totalorder %s1526_s30, 3 }
   0xc   : > { %p265_p9 = pnand %p1215_p7, %p264_p8 }
   0xd   : > { %p297_p10 = scmp.lt.s32.totalorder (!%p265_p9), %s1611_s9, 1  ;;  %s1532_s19 = smov (!%p265_p9), 88  }
   0xe   : > { %268 = sbr.rel (%p265_p9) target bundleno = 2477 (0x9ad), region = 52  ;;  %s1533_s20 = smov (!%p265_p9), 80  }
   0xf   : > { %s1535_s22 = smov (!%p265_p9), 72   ;;  %s1536_s23 = smov (!%p265_p9), 104  }
  0x10   : > { %s1537_s24 = smov (!%p265_p9), 64   ;;  %s1538_s25 = smov (!%p265_p9), 56  }
  0x11   : > { %s1539_s26 = smov (!%p265_p9), 48   ;;  %s1540_s10 = smov (!%p265_p9), 40  }
  0x12   : > { %s1541_s12 = smov (!%p265_p9), 8  }
  0x13   : > { %s298_s17 = scalar_select %p297_p10, %s1611_s9, 1  ;;  %vm304_vm0 = vcmask 261120   ;;  %v1430_v7 = vld [vmem:[%s1871_s1 + $0x8] sm:$0xff]   ;;  %v1528_v8 = vmov 0.0   ;;  %vm1529_vm1 = vmmov 0   ;;  %v1431_v9 = vld [vmem:[%s1871_s1] sm:$0xff]   ;;  %v319_v13 = vlaneseq }
  0x14   : > { %1283 = vmatprep.subr.bf16.mxu0 %v1528_v8  ;;  %1287 = vmatprep.mubr.msk.bf16.mxu0 %vm1529_vm1, %v1528_v8  ;;  %v1670_v16 = vld [vmem:[%s1877_s7] sm:$0x3f]  ;;  %vm405_vm2 = vcmask 64512   ;;  %vm470_vm4 = vcmask 1043456   ;;  %vm860_vm5 = vcmask 130048   ;;  %vm862_vm6 = vcmask 195584  }
  0x15   : > { %s1217_s18 = sshll.u32 %s298_s17, 3  ;;  %1284 = vmatpush3.bf16.msra.mxu0 %v1430_v7  ;;  %1303 = vmatprep.subr.bf16.mxu1 %v1528_v8  ;;  %v1664_v14 = vshrl.u32 %v319_v13, 7  ;;  %v1218_v25 = vld [vmem:[%s1872_s2] ss:$0 sm:$0xff]  ;;  %s1530_s17 = smov 120   ;;  %v399_v43 = vand.u32 127, %v319_v13 }
  0x16   : > { %s300_s21 = scalar_lea.vmem %s1870_s0, %s1217_s18  ;;  %1285 = vmatprep.subr.bf16.mxu0 %v1528_v8  ;;  %1305 = vmatprep.mubr.msk.bf16.mxu1 %vm1529_vm1, %v1528_v8  ;;  %s1531_s18 = smov 96  }
  0x17   : > { %v1643_v0 = vld [vmem:[%s300_s21] sm:$0xff]  ;;  %v321_v15 = vsub.s32 0, %v1664_v14  ;;  %v326_v17 = vsub.s32 1, %v1664_v14  ;;  %s1534_s21 = smov 112   ;;  %vm400_vm3 = vcmp.le.s32.totalorder %v399_v43, %v1664_v14 }
  0x18   : > { %v305_v1 = vsel %vm304_vm0, %v1643_v0, 0.0 }
  0x19   : > { %306 = vadd.xlane.f32.xlu0 %v305_v1  ;;  %1286 = vmatpush3.bf16.msra.mxu0 %v1431_v9  ;;  %v322_v18 = vrot.slane %v1670_v16, %v321_v15  ;;  %v327_v21 = vrot.slane %v1670_v16, %v326_v17 }
  0x1a   : > { %1291 = vmatprep.subr.bf16.mxu0 %v1528_v8 }
  0xa2   : > { %v307_v2 = vpop.xlane.xlu0 %306 }
  0xa3   : > { %v309_v3 = vmul.f32 0.03125, %v307_v2 }
  0xa5   : > { %v310_v4 = vsub.f32 %v1643_v0, %v309_v3 }
  0xa7   : > { %v311_v5 = vmul.f32 %v310_v4, %v310_v4 }
  0xa9   : > { %v312_v6 = vsel %vm304_vm0, %v311_v5, 0.0 }
  0xaa   : > { %313 = vadd.xlane.f32.xlu0 %v312_v6 }
 0x133   : > { %v314_v10 = vpop.xlane.xlu0 %313 }
 0x134   : > { %v315_v11 = vmul.f32 0.03125, %v314_v10 }
 0x136   : > { %v316_v12 = vadd.f32 1e-12, %v315_v11 }
 0x138   : > { %1444 = vrsqrt.f32 %v316_v12 }
 0x145   : > { %v1445_v19 = vpop.eup %1444 }
 0x146   : > { %v318_v20 = vmul.f32 %v1445_v19, %v310_v4 }
 0x148   : > { %v323_v22 = vmul.f32 %v322_v18, %v318_v20 }
 0x14a   : > { %v328_v23 = vadd.f32 %v327_v21, %v323_v22 }
 0x14c   : > { %v329_v24 = vpack.c.bf16 %v328_v23, %v328_v23 }
 0x14e   : > { %1288 = vmatmul.mubr.msk.bf16.vlgmr.msra.gmra.mxu0 %vm304_vm0, %v329_v24 }
 0x14f   : > { %1293 = vmatprep.mubr.msk.bf16.mxu0 %vm1529_vm1, %v1528_v8 }
 0x20e   : > { %v390_v26 = vpop.f32.mrf.mxu0 }
 0x20f   : > { %v391_v27 = vadd.f32 %v1218_v25, %v390_v26 }
 0x210   : > { %v1289_v28 = vpop.f32.mrf.mxu0 }
 0x211   : > { %v1681_v29 = vpack.c.bf16 %v391_v27, %v391_v27 }
 0x212   : > { %v393_v30 = vpop.f32.mrf.mxu0 }
 0x213   : > { %514 = vrot.lane.b32.xlu0 %v1681_v29, %s1530_s17  ;;  %403 = vrot.lane.b32.xlu1 %v1681_v29, %s1531_s18  ;;  %s294_s18 = sand.u32 1, %s1518_s28  }
 0x214   : > { %v1290_v31 = vpop.f32.mrf.mxu0 }
 0x217   : > { %516 = vrot.lane.b32.xlu1 %v1681_v29, %s1532_s19  ;;  %s1216_s19 = sshll.u32 %s294_s18, 3 }
 0x21b   : > { %627 = vrot.lane.b32.xlu1 %v1681_v29, %s1533_s20  ;;  %s1542_s20 = smov 16  }
 0x21f   : > { %625 = vrot.lane.b32.xlu1 %v1681_v29, %s1534_s21  ;;  %s1543_s21 = smov 24  }
 0x223   : > { %738 = vrot.lane.b32.xlu1 %v1681_v29, %s1535_s22 }
 0x227   : > { %736 = vrot.lane.b32.xlu1 %v1681_v29, %s1536_s23 }
 0x285   : > { %v404_v32 = vpop.permute.xlu1 %403  ;;  %v515_v37 = vpop.permute.xlu0 %514 }
 0x286   : > { %v410_v33 = vsel %vm405_vm2, %v404_v32, 0 }
 0x287   : > { %1292 = vmatpush3.bf16.xpose.msra.mxu0 %v410_v33 }
 0x288   : > { %1297 = vmatprep.subr.bf16.mxu0 %v1528_v8 }
 0x289   : > { %v517_v34 = vpop.permute.xlu1 %516 }
 0x28a   : > { %v522_v35 = vsel %vm405_vm2, %v517_v34, 0 }
 0x28b   : > { %1304 = vmatpush3.bf16.xpose.msra.mxu1 %v522_v35 }
 0x28c   : > { %1315 = vmatprep.subr.bf16.mxu1 %v1528_v8 }
 0x28d   : > { %v628_v36 = vpop.permute.xlu1 %627 }
 0x28e   : > { %1294 = vmatmul.mubr.msk.bf16.vlgmr.msra.gmra.mxu0 %vm405_vm2, %v1681_v29  ;;  %v633_v39 = vsel %vm405_vm2, %v628_v36, 0 }
 0x28f   : > { %1299 = vmatprep.mubr.msk.bf16.mxu0 %vm1529_vm1, %v1528_v8 }
 0x291   : > { %v626_v38 = vpop.permute.xlu1 %625 }
 0x292   : > { %1306 = vmatmul.mubr.msk.bf16.vlgmr.msra.gmra.mxu1 %vm405_vm2, %v515_v37 }
 0x293   : > { %1316 = vmatpush3.bf16.xpose.msra.mxu1 %v633_v39  ;;  %1317 = vmatprep.mubr.msk.bf16.mxu1 %vm1529_vm1, %v1528_v8 }
 0x294   : > { %1327 = vmatprep.subr.bf16.mxu1 %v1528_v8 }
 0x295   : > { %v739_v40 = vpop.permute.xlu1 %738 }
 0x296   : > { %v744_v41 = vsel %vm405_vm2, %v739_v40, 0 }
 0x299   : > { %v737_v42 = vpop.permute.xlu1 %736 }
 0x29a   : > { %1318 = vmatmul.mubr.msk.bf16.vlgmr.msra.gmra.mxu1 %vm405_vm2, %v626_v38 }
 0x29b   : > { %1328 = vmatpush3.bf16.xpose.msra.mxu1 %v744_v41  ;;  %1329 = vmatprep.mubr.msk.bf16.mxu1 %vm1529_vm1, %v1528_v8 }
 0x29c   : > { %1339 = vmatprep.subr.bf16.mxu1 %v1528_v8 }
 0x2a2   : > { %1330 = vmatmul.mubr.msk.bf16.vlgmr.msra.gmra.mxu1 %vm405_vm2, %v737_v42 }
 0x2a3   : > { %1343 = vmatprep.mubr.msk.bf16.mxu1 %vm1529_vm1, %v1528_v8 }
 0x34e   : > { %v446_v44 = vpop.f32.mrf.mxu0 }
 0x34f   : > { %v452_v45 = vsel %vm400_vm3, %v446_v44, -1e+10 }
 0x350   : > { %v1295_v46 = vpop.f32.mrf.mxu0  ;;  %v453_v47 = vsel %vm405_vm2, %v452_v45, -inf }
 0x351   : > { %454 = vmax.xlane.f32.xlu1 %v453_v47 }
 0x352   : > { %v449_v48 = vpop.f32.mrf.mxu0  ;;  %v558_v49 = vpop.f32.mrf.mxu1 }
 0x353   : > { %v564_v50 = vsel %vm400_vm3, %v558_v49, -1e+10 }
 0x354   : > { %v1296_v51 = vpop.f32.mrf.mxu0  ;;  %v1307_v52 = vpop.f32.mrf.mxu1  ;;  %v565_v53 = vsel %vm405_vm2, %v564_v50, -inf }
 0x355   : > { %566 = vmax.xlane.f32.xlu0 %v565_v53 }
 0x356   : > { %v561_v54 = vpop.f32.mrf.mxu1 }
 0x358   : > { %v1308_v55 = vpop.f32.mrf.mxu1 }
 0x35a   : > { %v669_v56 = vpop.f32.mrf.mxu1 }
 0x35b   : > { %v675_v57 = vsel %vm400_vm3, %v669_v56, -1e+10 }
 0x35c   : > { %v1319_v58 = vpop.f32.mrf.mxu1  ;;  %v676_v59 = vsel %vm405_vm2, %v675_v57, -inf }
 0x35d   : > { %677 = vmax.xlane.f32.xlu1 %v676_v59 }
 0x35e   : > { %v672_v60 = vpop.f32.mrf.mxu1 }
 0x35f   : > { %v1432_v60 = vld [vmem:[%s1873_s3 + $0x8] sm:$0xff]  }
 0x360   : > { %v1320_v61 = vpop.f32.mrf.mxu1  ;;  %1340 = vmatpush3.bf16.msra.mxu1 %v1432_v60 }
 0x361   : > { %1341 = vmatprep.subr.bf16.mxu1 %v1528_v8  ;;  %v1433_v61 = vld [vmem:[%s1873_s3] sm:$0xff]  }
 0x362   : > { %v780_v62 = vpop.f32.mrf.mxu1 }
 0x363   : > { %v786_v63 = vsel %vm400_vm3, %v780_v62, -1e+10 }
 0x364   : > { %v1331_v1 = vpop.f32.mrf.mxu1  ;;  %v787_v2 = vsel %vm405_vm2, %v786_v63, -inf  ;;  %1342 = vmatpush3.bf16.msra.mxu1 %v1433_v61 }
 0x365   : > { %788 = vmax.xlane.f32.xlu0 %v787_v2  ;;  %1355 = vmatprep.subr.bf16.mxu1 %v1528_v8 }
 0x366   : > { %v783_v3 = vpop.f32.mrf.mxu1 }
 0x368   : > { %v1332_v4 = vpop.f32.mrf.mxu1 }
 0x3da   : > { %v455_v5 = vpop.xlane.xlu1 %454 }
 0x3db   : > { %v456_v6 = vsub.f32 %v452_v45, %v455_v5 }
 0x3dd   : > { %v457_v7 = vmul.f32 1.442695, %v456_v6 }
 0x3de   : > { %v567_v9 = vpop.xlane.xlu0 %566 }
 0x3df   : > { %1446 = vpow2.f32 %v457_v7  ;;  %v568_v10 = vsub.f32 %v564_v50, %v567_v9 }
 0x3e1   : > { %v569_v11 = vmul.f32 1.442695, %v568_v10 }
 0x3e3   : > { %1448 = vpow2.f32 %v569_v11 }
 0x3e6   : > { %v678_v23 = vpop.xlane.xlu1 %677 }
 0x3e7   : > { %v679_v24 = vsub.f32 %v675_v57, %v678_v23 }
 0x3e9   : > { %v680_v25 = vmul.f32 1.442695, %v679_v24 }
 0x3ec   : > { %v1447_v12 = vpop.eup %1446 }
 0x3ed   : > { %v459_v13 = vsel %vm405_vm2, %v1447_v12, 0.0 }
 0x3ee   : > { %v789_v15 = vpop.xlane.xlu0 %788  ;;  %460 = vadd.xlane.f32.xlu1 %v459_v13 }
 0x3ef   : > { %v790_v17 = vsub.f32 %v786_v63, %v789_v15 }
 0x3f0   : > { %v1449_v18 = vpop.eup %1448 }
 0x3f1   : > { %v791_v19 = vmul.f32 1.442695, %v790_v17  ;;  %v571_v20 = vsel %vm405_vm2, %v1449_v18, 0.0  ;;  %v871_v17 = vsub.s32 4, %v1664_v14 }
 0x3f2   : > { %572 = vadd.xlane.f32.xlu0 %v571_v20 }
 0x3f3   : > { %1450 = vpow2.f32 %v791_v19 }
 0x3f4   : > { %1452 = vpow2.f32 %v680_v25 }
 0x3ff   : > { %465 = vrot.lane.b32.xlu1 %v1681_v29, %s1537_s24 }
 0x400   : > { %v1451_v21 = vpop.eup %1450 }
 0x401   : > { %v793_v22 = vsel %vm405_vm2, %v1451_v21, 0.0  ;;  %v1453_v26 = vpop.eup %1452 }
 0x402   : > { %794 = vadd.xlane.f32.xlu0 %v793_v22  ;;  %v682_v27 = vsel %vm405_vm2, %v1453_v26, 0.0 }
 0x418   : > { %577 = vrot.lane.b32.xlu0 %v1681_v29, %s1538_s25 }
 0x423   : > { %683 = vadd.xlane.f32.xlu1 %v682_v27 }
 0x434   : > { %688 = vrot.lane.b32.xlu1 %v1681_v29, %s1539_s26 }
 0x438   : > { %799 = vrot.lane.b32.xlu1 %v1681_v29, %s1540_s10  ;;  %s1544_s10 = smov [#allocation2]  }
 0x477   : > { %v461_v28 = vpop.xlane.xlu1 %460 }
 0x478   : > { %1454 = vrcp.f32 %v461_v28 }
 0x47b   : > { %v573_v30 = vpop.xlane.xlu0 %572  ;;  %v466_v31 = vpop.permute.xlu1 %465 }
 0x47c   : > { %v472_v32 = vsel %vm470_vm4, %v466_v31, 0  ;;  %1456 = vrcp.f32 %v573_v30 }
 0x47d   : > { %1298 = vmatpush3.bf16.msra.mxu0 %v472_v32  ;;  %v1434_v32 = vld [vmem:[%s1874_s4 + $0x8] sm:$0xff]  }
 0x47e   : > { %1309 = vmatprep.subr.bf16.mxu0 %v1528_v8 }
 0x485   : > { %v1455_v33 = vpop.eup %1454 }
 0x486   : > { %v463_v34 = vmul.f32 %v1455_v33, %v1447_v12 }
 0x488   : > { %v464_v35 = vpack.c.bf16 %v463_v34, %v463_v34 }
 0x489   : > { %v1457_v36 = vpop.eup %1456 }
 0x48a   : > { %1300 = vmatmul.mubr.msk.bf16.vlgmr.msra.gmra.mxu0 %vm405_vm2, %v464_v35  ;;  %v575_v29 = vmul.f32 %v1457_v36, %v1449_v18  ;;  %v872_v18 = vrot.slane %v1670_v16, %v871_v17  ;;  %v944_v36 = vsub.s32 2, %v1664_v14 }
 0x48b   : > { %v795_v37 = vpop.xlane.xlu0 %794  ;;  %1311 = vmatprep.mubr.msk.bf16.mxu0 %vm1529_vm1, %v1528_v8 }
 0x48c   : > { %v576_v40 = vpack.c.bf16 %v575_v29, %v575_v29  ;;  %v945_v29 = vrot.slane %v1670_v16, %v944_v36 }
 0x48f   : > { %v578_v38 = vpop.permute.xlu0 %577 }
 0x490   : > { %v583_v39 = vsel %vm470_vm4, %v578_v38, 0 }
 0x491   : > { %1310 = vmatpush3.bf16.msra.mxu0 %v583_v39 }
 0x492   : > { %1321 = vmatprep.subr.bf16.mxu0 %v1528_v8 }
 0x494   : > { %1312 = vmatmul.mubr.msk.bf16.vlgmr.msra.gmra.mxu0 %vm405_vm2, %v576_v40 }
 0x495   : > { %1323 = vmatprep.mubr.msk.bf16.mxu0 %vm1529_vm1, %v1528_v8 }
 0x4ac   : > { %v684_v41 = vpop.xlane.xlu1 %683 }
 0x4ad   : > { %1458 = vrcp.f32 %v684_v41 }
 0x4ae   : > { %1460 = vrcp.f32 %v795_v37  ;;  %v949_v37 = vsub.s32 3, %v1664_v14 }
 0x4b0   : > { %v689_v42 = vpop.permute.xlu1 %688  ;;  %v950_v40 = vrot.slane %v1670_v16, %v949_v37 }
 0x4b1   : > { %v694_v43 = vsel %vm470_vm4, %v689_v42, 0 }
 0x4b2   : > { %1322 = vmatpush3.bf16.msra.mxu0 %v694_v43 }
 0x4b3   : > { %1333 = vmatprep.subr.bf16.mxu0 %v1528_v8 }
 0x4b4   : > { %v800_v46 = vpop.permute.xlu1 %799 }
 0x4b5   : > { %v805_v49 = vsel %vm470_vm4, %v800_v46, 0  ;;  %v1438_v46 = vld [vmem:[%s1876_s6 + $0x28] sm:$0xff]  }
 0x4ba   : > { %v1459_v44 = vpop.eup %1458 }
 0x4bb   : > { %v686_v45 = vmul.f32 %v1459_v44, %v1453_v26  ;;  %v1461_v48 = vpop.eup %1460  ;;  %v1436_v44 = vld [vmem:[%s1876_s6 + $0x38] sm:$0xff]  }
 0x4bc   : > { %v797_v50 = vmul.f32 %v1461_v48, %v1451_v21  ;;  %v1440_v48 = vld [vmem:[%s1876_s6 + $0x18] sm:$0xff]  }
 0x4bd   : > { %v687_v47 = vpack.c.bf16 %v686_v45, %v686_v45  ;;  %v1437_v45 = vld [vmem:[%s1876_s6 + $0x30] sm:$0xff]  }
 0x4be   : > { %v798_v51 = vpack.c.bf16 %v797_v50, %v797_v50  ;;  %v1442_v50 = vld [vmem:[%s1876_s6 + $0x8] sm:$0xff]  }
 0x4bf   : > { %1324 = vmatmul.mubr.msk.bf16.vlgmr.msra.gmra.mxu0 %vm405_vm2, %v687_v47  ;;  %v1439_v47 = vld [vmem:[%s1876_s6 + $0x20] sm:$0xff]  }
 0x4c0   : > { %1334 = vmatpush3.bf16.msra.mxu0 %v805_v49  ;;  %1335 = vmatprep.mubr.msk.bf16.mxu0 %vm1529_vm1, %v1528_v8  ;;  %v1441_v49 = vld [vmem:[%s1876_s6 + $0x10] sm:$0xff]  }
 0x4c1   : > { %1347 = vmatprep.subr.bf16.mxu0 %v1528_v8 }
 0x4c7   : > { %1336 = vmatmul.mubr.msk.bf16.vlgmr.msra.gmra.mxu0 %vm405_vm2, %v798_v51  ;;  %v1443_v51 = vld [vmem:[%s1876_s6] sm:$0xff]  }
 0x4c8   : > { %1351 = vmatprep.mubr.msk.bf16.mxu0 %vm1529_vm1, %v1528_v8  ;;  %1348 = vmatpush3.bf16.msra.mxu0 %v1434_v32 }
 0x4c9   : > { %1349 = vmatprep.subr.bf16.mxu0 %v1528_v8 }
 0x54a   : > { %v508_v52 = vpop.f32.mrf.mxu0 }
 0x54c   : > { %v1301_v53 = vpop.f32.mrf.mxu0 }
 0x54e   : > { %v511_v54 = vpop.f32.mrf.mxu0 }
 0x550   : > { %v1302_v55 = vpop.f32.mrf.mxu0 }
 0x554   : > { %v619_v56 = vpop.f32.mrf.mxu0 }
 0x555   : > { %848 = vrot.lane.b32.xlu0 %v619_v56, %s1541_s12  ;;  %s1470_s12 = sshll.u32 %s1544_s10, 4  ;;  %s1471_s12 = int_to_ptr.vmem [resolvable:$false] %s1470_s12 }
 0x556   : > { %v1313_v57 = vpop.f32.mrf.mxu0  ;;  %s1472_s13 = scalar_lea.vmem %s1471_s12, 256 }
 0x558   : > { %v622_v58 = vpop.f32.mrf.mxu0 }
 0x55a   : > { %v1314_v59 = vpop.f32.mrf.mxu0 }
 0x57f   : > { %v730_v62 = vpop.f32.mrf.mxu0 }
 0x580   : > { %852 = vrot.lane.b32.xlu1 %v730_v62, %s1542_s20  ;;  %s1246_s20 = sshll.u32 %s1611_s9, 7  ;;  %s1140_s9 = scalar_lea.sflag [#allocation3], %s294_s18 }
 0x581   : > { %v1325_v63 = vpop.f32.mrf.mxu0  ;;  %s1828_s25 = scalar_lea.hbm %s1878_s8, %s1246_s20 }
 0x583   : > { %v733_v1 = vpop.f32.mrf.mxu0 }
 0x585   : > { %v1326_v2 = vpop.f32.mrf.mxu0 }
 0x587   : > { %v841_v3 = vpop.f32.mrf.mxu0 }
 0x588   : > { %856 = vrot.lane.b32.xlu0 %v841_v3, %s1543_s21  ;;  %s296_s21 = scalar_lea.vmem [#allocation2], %s1216_s19 }
 0x589   : > { %v1337_v4 = vpop.f32.mrf.mxu0  ;;  %s1153_s22 = sshll.u32 %s296_s21, 4  ;;  %s1830_s22 = int_to_ptr.vmem [resolvable:$true] %s1153_s22 }
 0x58a   : > { %v1047_v4 = vsub.s32 5, %v1664_v14  ;;  %s1466_s26 = scalar_lea.vmem %s1830_s22, 128  ;;  %p1473_p0 = scmp.lt.s32.totalorder %s1830_s22, %s1471_s12 }
 0x58b   : > { %v844_v5 = vpop.f32.mrf.mxu0  ;;  %p1467_p11 = scmp.ne.s32.totalorder %s1830_s22, %s1466_s26  ;;  %p1474_p1 = scmp.lt.s32.totalorder %s1472_s13, %s1466_s26 }
 0x58c   : > { %v1048_v5 = vrot.slane %v1670_v16, %v1047_v4 }
 0x58d   : > { %v1338_v6 = vpop.f32.mrf.mxu0  ;;  %p1468_p12 = pnand %p1467_p11, %p1628_p5  ;;  %p1475_p2 = por %p1474_p1, %p1473_p0 }
 0x58f   : > { %p1469_p13 = pneg %p1468_p12 }
 0x591   : > { %p1476_p3 = pnand %p1475_p2, %p1469_p13 }
 0x5c7   : > { %v849_v7 = vpop.permute.xlu0 %848 }
 0x5c8   : > { %v859_v10 = vsel %vm405_vm2, %v508_v52, %v849_v7  ;;  %v1233_v52 = vld [vmem:[%s1875_s5] ss:$0 sm:$0xff] }
 0x5f2   : > { %v853_v9 = vpop.permute.xlu1 %852 }
 0x5f3   : > { %v861_v11 = vsel %vm860_vm5, %v859_v10, %v853_v9 }
 0x5fa   : > { %v857_v12 = vpop.permute.xlu0 %856 }
 0x5fb   : > { %v863_v13 = vsel %vm862_vm6, %v861_v11, %v857_v12 }
 0x5fc   : > { %v864_v15 = vpack.c.bf16 %v863_v13, %v863_v13 }
 0x5fe   : > { %1344 = vmatmul.mubr.msk.bf16.vlgmr.msra.gmra.mxu1 %vm304_vm0, %v864_v15 }
 0x5ff   : > { %1371 = vmatprep.mubr.msk.bf16.mxu1 %vm1529_vm1, %v1528_v8  ;;  %1356 = vmatpush3.bf16.msra.mxu1 %v1436_v44 }
 0x600   : > { %1357 = vmatprep.subr.bf16.mxu1 %v1528_v8 }
 0x603   : > { %1358 = vmatpush3.bf16.msra.mxu1 %v1437_v45 }
 0x604   : > { %1359 = vmatprep.subr.bf16.mxu1 %v1528_v8 }
 0x607   : > { %1360 = vmatpush3.bf16.msra.mxu1 %v1438_v46 }
 0x608   : > { %1361 = vmatprep.subr.bf16.mxu1 %v1528_v8 }
 0x60b   : > { %1362 = vmatpush3.bf16.msra.mxu1 %v1439_v47 }
 0x60c   : > { %1363 = vmatprep.subr.bf16.mxu1 %v1528_v8 }
 0x60f   : > { %1364 = vmatpush3.bf16.msra.mxu1 %v1440_v48 }
 0x610   : > { %1365 = vmatprep.subr.bf16.mxu1 %v1528_v8 }
 0x613   : > { %1366 = vmatpush3.bf16.msra.mxu1 %v1441_v49 }
 0x614   : > { %1367 = vmatprep.subr.bf16.mxu1 %v1528_v8 }
 0x617   : > { %1368 = vmatpush3.bf16.msra.mxu1 %v1442_v50 }
 0x618   : > { %1369 = vmatprep.subr.bf16.mxu1 %v1528_v8 }
 0x61b   : > { %1370 = vmatpush3.bf16.msra.mxu1 %v1443_v51 }
 0x6be   : > { %v922_v19 = vpop.f32.mrf.mxu1 }
 0x6bf   : > { %v923_v20 = vadd.f32 %v922_v19, %v872_v18 }
 0x6c0   : > { %v1345_v21 = vpop.f32.mrf.mxu1 }
 0x6c1   : > { %v1768_v22 = vadd.f32 %v923_v20, %v1643_v0  ;;  %v1435_v0 = vld [vmem:[%s1874_s4] sm:$0xff]  }
 0x6c2   : > { %v925_v23 = vpop.f32.mrf.mxu1  ;;  %1350 = vmatpush3.bf16.msra.mxu0 %v1435_v0 }
 0x6c3   : > { %v929_v24 = vsel %vm304_vm0, %v1768_v22, 0.0 }
 0x6c4   : > { %930 = vadd.xlane.f32.xlu1 %v929_v24  ;;  %v1346_v25 = vpop.f32.mrf.mxu1 }
 0x74d   : > { %v931_v26 = vpop.xlane.xlu1 %930 }
 0x74e   : > { %v932_v27 = vmul.f32 0.03125, %v931_v26 }
 0x750   : > { %v933_v28 = vsub.f32 %v1768_v22, %v932_v27 }
 0x752   : > { %v934_v30 = vmul.f32 %v933_v28, %v933_v28 }
 0x754   : > { %v935_v31 = vsel %vm304_vm0, %v934_v30, 0.0 }
 0x755   : > { %936 = vadd.xlane.f32.xlu0 %v935_v31 }
 0x7de   : > { %v937_v33 = vpop.xlane.xlu0 %936 }
 0x7df   : > { %v938_v34 = vmul.f32 0.03125, %v937_v33 }
 0x7e1   : > { %v939_v35 = vadd.f32 1e-12, %v938_v34 }
 0x7e3   : > { %1462 = vrsqrt.f32 %v939_v35 }
 0x7f0   : > { %v1463_v38 = vpop.eup %1462 }
 0x7f1   : > { %v941_v39 = vmul.f32 %v1463_v38, %v933_v28 }
 0x7f3   : > { %v946_v41 = vmul.f32 %v945_v29, %v941_v39 }
 0x7f5   : > { %v951_v42 = vadd.f32 %v950_v40, %v946_v41 }
 0x7f7   : > { %v952_v43 = vpack.c.bf16 %v951_v42, %v951_v42 }
 0x7f9   : > { %1352 = vmatmul.mubr.msk.bf16.vlgmr.msra.gmra.mxu0 %vm304_vm0, %v952_v43 }
 0x8b9   : > { %v1013_v53 = vpop.f32.mrf.mxu0 }
 0x8ba   : > { %v1014_v54 = vadd.f32 %v1233_v52, %v1013_v53 }
 0x8bb   : > { %v1353_v55 = vpop.f32.mrf.mxu0 }
 0x8bc   : > { %v1020_v56 = vmul.f32 0.044715, %v1014_v54  ;;  %v1019_v8 = vmul.f32 0.5, %v1014_v54 }
 0x8bd   : > { %v1016_v57 = vpop.f32.mrf.mxu0 }
 0x8be   : > { %v1021_v58 = vmul.f32 %v1020_v56, %v1014_v54 }
 0x8bf   : > { %v1354_v59 = vpop.f32.mrf.mxu0 }
 0x8c0   : > { %v1022_v60 = vmul.f32 %v1021_v58, %v1014_v54 }
 0x8c2   : > { %v1023_v61 = vadd.f32 %v1022_v60, %v1014_v54 }
 0x8c4   : > { %v1024_v62 = vmul.f32 0.7978846, %v1023_v61 }
 0x8c6   : > { %1464 = vtanh.f32 %v1024_v62 }
 0x8d3   : > { %v1465_v63 = vpop.eup %1464 }
 0x8d4   : > { %v1026_v1 = vadd.f32 1.0, %v1465_v63 }
 0x8d6   : > { %v1027_v2 = vmul.f32 %v1026_v1, %v1019_v8 }
 0x8d8   : > { %v1028_v3 = vpack.c.bf16 %v1027_v2, %v1027_v2 }
 0x8da   : > { %1372 = vmatmul.mubr.bf16.vlgmr.msra.gmra.mxu1 %v1028_v3 }
 0x99a   : > { %v1131_v6 = vpop.f32.mrf.mxu1 }
 0x99b   : > { %v1132_v7 = vadd.f32 %v1131_v6, %v1048_v5 }
 0x99c   : > { %v1373_v9 = vpop.f32.mrf.mxu1 }
 0x99d   : > { %v1137_v10 = vadd.f32 %v1132_v7, %v1768_v22 }
 0x99e   : > { %v1134_v14 = vpop.f32.mrf.mxu1 }
 0x99f   : > { %1138 = vst.msk [vmem:[%s296_s21] sm:$0xff] %vm304_vm0, %v1137_v10 }
 0x9a0   : > { %v1374_v16 = vpop.f32.mrf.mxu1 }
 0x9a1   : > { %1479 = shalt.err (!%p1476_p3)
}
 0x9a2   : > { %s1480_s17 = scalar_lea.hbm %s1828_s25, 128  ;;  %s1484_s20 = scalar_lea.hbm %s1878_s8, 256 }
 0x9a3   : > { %p1481_p4 = scmp.ne.s32.totalorder %s1828_s25, %s1480_s17  ;;  %p1485_p9 = scmp.lt.s32.totalorder %s1828_s25, %s1878_s8 }
 0x9a4   : > { %p1486_p10 = scmp.lt.s32.totalorder %s1484_s20, %s1480_s17 }
 0x9a5   : > { %p1482_p7 = pnand %p1481_p4, %p1628_p5 }
 0x9a6   : > { %p1487_p11 = por %p1486_p10, %p1485_p9 }
 0x9a7   : > { %p1483_p8 = pneg %p1482_p7 }
 0x9a9   : > { %p1488_p12 = pnand %p1487_p11, %p1483_p8 }
 0x9ab   : > { %1491 = shalt.err (!%p1488_p12)
}
 0x9ac   : > { %1375 = dma.vmem_to_hbm [thread:$0]  (%p1628_p5), %s1830_s22, 128, %s1828_s25, %s1140_s9  }
 0x9ad PF: > { %p1381_p13 = scmp.ge.s32.totalorder %s1526_s30, 2  ;;  %s1165_s24 = sand.u32 1, %s1514_s27  }
 0x9ae   : > { %s1166_s26 = scalar_lea.sflag [#allocation3], %s1165_s24 }
 0x9af   : > { %p1378_p0 = pnand %p1381_p13, %p1632_p6 }
 0x9b1   : > { %p1379_p1 = pneg %p1378_p0 }
 0x9b3   : > { %1509 = dma.done.wait (%p1379_p1), %s1166_s26, 128  }
 0x9b4   : > { %1511 = vsyncadd (%p1379_p1), %s1166_s26, 4294967168  ;;  %p18_p2 = scmp.ge.s32.totalorder %s1615_s11, 4   ;;  %s1881_s27 = smov %s1518_s28 }
 0x9b5   : > { %s1882_s28 = smov %s1522_s29  ;;  %s1883_s29 = smov %s1626_s14 }
 0x9b6   : > { %s1884_s30 = smov %s1615_s11  ;;  %20 = sbr.rel (!%p18_p2) target bundleno = 3 (0x3), region = 87 }
 0x9bb   :  { %1171 = vsyncpa [#allocation3], 1 }
 0x9bc   :  { %1173 = vsyncpa [#allocation3 + $0x1], 1 }

</bundles_post_ra>
